<compile_context>
chip_gen: v5e
topology: v5e:2x2
jax: 0.10.0
libtpu: 0.0.40
codegen_flags: <defaults>
</compile_context>

<pallas_src>
import jax
import jax.numpy as jnp
from jax import lax
from jax.experimental import pallas as pl
from jax.experimental.pallas import tpu as pltpu

EPS = 1e-5


def _octnet_block_kernel(lhs_ref, wbig_ref, b_ref, g_ref, bt_ref,
                         p_ref, pt_ref, heo_ref, seo_ref, out_ref):
    # lhs_ref : (N*Ho, KH*W*Cin)   im2col-along-H activation, rows=(n,ho), lanes=(kh,w,ci)
    # wbig_ref: (KH*W*Cin, Wo*Cout) block-Toeplitz conv weights
    # b_ref   : (1, Wo*Cout)       conv bias tiled over wo
    # g_ref   : (1, Cout)          BN gamma
    # bt_ref  : (1, Cout)          BN beta
    # p_ref   : (Wo*Cout, Cout)    (wo,c)-lane -> channel sum selector
    # pt_ref  : (Cout, Wo*Cout)    channel -> (wo,c)-lane tiling selector
    # heo_ref : (2*NHp_pad, N*Ho)  stacked [even ; odd] row selectors (maxpool H)
    # seo_ref : (Wo*Cout, 2*PAD)   stacked [even | odd] col selectors (maxpool W)
    # out_ref : (NHp_pad, PAD)     pooled output, rows/lanes zero-padded
    f32 = jnp.float32
    NHo = lhs_ref.shape[0]
    WC = wbig_ref.shape[1]
    Cout = g_ref.shape[1]
    Wo = WC // Cout
    half_rows = heo_ref.shape[0] // 2        # NHp_pad (sublane-aligned)
    PAD = seo_ref.shape[1] // 2              # lane-aligned half width (multiple of 128)

    # ---- Conv (VALID, stride 1) as a single MXU matmul + bias + ReLU ----
    y = jnp.dot(lhs_ref[...], wbig_ref[...], preferred_element_type=f32)
    y = jnp.maximum(y + b_ref[...], 0.0)                               # (NHo, WC)

    # ---- BatchNorm2d training-mode statistics (single pass, merged M=2 reductions) ----
    s_row = jnp.sum(y, axis=0, keepdims=True)                          # (1, WC)
    ss_row = jnp.sum(y * y, axis=0, keepdims=True)                     # (1, WC)
    rid = lax.broadcasted_iota(jnp.int32, (2, WC), 0)
    stats = jnp.where(rid == 0, s_row, ss_row)                         # (2, WC) [sum ; sumsq]
    inv_cnt = 1.0 / float(NHo * Wo)
    red = jnp.dot(stats, p_ref[...], preferred_element_type=f32) * inv_cnt   # (2, Cout)
    mean = red[0:1, :]
    var = jnp.maximum(red[1:2, :] - mean * mean, 0.0)                  # clamp before rsqrt
    scale_c = g_ref[...] * lax.rsqrt(var + EPS)                        # (1, Cout)
    shift_c = bt_ref[...] - mean * scale_c
    ridc = lax.broadcasted_iota(jnp.int32, (2, Cout), 0)
    sc_sh = jnp.where(ridc == 0, scale_c, shift_c)                     # (2, Cout)
    ssw = jnp.dot(sc_sh, pt_ref[...], preferred_element_type=f32)      # (2, WC)

    # ---- BN affine (applied pre-pool -> exact even for negative gamma) ----
    yb = y * ssw[0:1, :] + ssw[1:2, :]                                 # (NHo, WC)

    # ---- MaxPool2d(2): one stacked selector matmul per axis + aligned-slice max ----
    rows = jnp.dot(heo_ref[...], yb, preferred_element_type=f32)       # (2*NHp_pad, WC)
    yh = jnp.maximum(rows[:half_rows, :], rows[half_rows:, :])         # (NHp_pad, WC)
    cols = jnp.dot(yh, seo_ref[...], preferred_element_type=f32)       # (NHp_pad, 2*PAD)
    out_ref[...] = jnp.maximum(cols[:, :PAD], cols[:, PAD:])           # lane-dense store


def basic_block_octnet(x_nchw, conv_w_oihw, conv_b, bn_gamma, bn_beta):
    N, Cin, H, W = x_nchw.shape
    Cout, _, KH, KW = conv_w_oihw.shape
    Ho, Wo = H - KH + 1, W - KW + 1
    Hp, Wp = Ho // 2, Wo // 2
    f32 = jnp.float32
    WC = Wo * Cout
    WpC = Wp * Cout
    NHp = N * Hp
    NHp_pad = ((NHp + 7) // 8) * 8                 # sublane-aligned odd-half offset
    PAD = max(128, ((WpC + 127) // 128) * 128)     # lane-dense output width

    # --- activation: im2col along H (pure layout plumbing), rows=(n,ho), lanes=(kh,w,ci) ---
    x_nhwc = jnp.transpose(x_nchw, (0, 2, 3, 1)).astype(f32)            # (N,H,W,Cin)
    lhs = jnp.concatenate(
        [x_nhwc[:, kh:kh + Ho].reshape(N, Ho, W * Cin) for kh in range(KH)],
        axis=-1).reshape(N * Ho, KH * W * Cin)

    # --- block-Toeplitz conv weights: rows=(kh,w_in,ci), cols=(wo,co) ---
    w_hwio = jnp.transpose(conv_w_oihw, (2, 3, 1, 0)).astype(f32)       # (KH,KW,Cin,Cout)
    eye_c = jnp.eye(Cout, dtype=f32)
    wbig = jnp.concatenate([
        sum(jnp.kron(jnp.eye(W, Wo, -kw, dtype=f32), w_hwio[kh, kw]) for kw in range(KW))
        for kh in range(KH)], axis=0)                                   # (KH*W*Cin, Wo*Cout)
    # TODO(synk): at realistic OCT widths this dense Toeplitz slab is O(W^2) and mostly
    # zeros; tile over Wo with banded blocks (or im2col along W) before scaling up.

    b_t = jnp.tile(conv_b.astype(f32), Wo)[None, :]                     # (1, Wo*Cout)
    g = bn_gamma.astype(f32).reshape(1, Cout)
    bt = bn_beta.astype(f32).reshape(1, Cout)
    p = jnp.tile(eye_c, (Wo, 1))                                        # (Wo*Cout, Cout)
    pt = jnp.transpose(p)                                               # (Cout, Wo*Cout)

    # --- maxpool 0/1 selectors (exact) ---
    he = jnp.kron(jnp.eye(N, dtype=f32), jnp.eye(Ho, dtype=f32)[0:2 * Hp:2, :])  # (NHp, N*Ho)
    ho = jnp.kron(jnp.eye(N, dtype=f32), jnp.eye(Ho, dtype=f32)[1:2 * Hp:2, :])
    heo = jnp.zeros((2 * NHp_pad, N * Ho), f32)
    heo = heo.at[0:NHp].set(he).at[NHp_pad:NHp_pad + NHp].set(ho)
    se = jnp.kron(jnp.eye(Wo, dtype=f32)[:, 0:2 * Wp:2], eye_c)         # (Wo*Cout, Wp*Cout)
    so = jnp.kron(jnp.eye(Wo, dtype=f32)[:, 1:2 * Wp:2], eye_c)
    seo = jnp.zeros((WC, 2 * PAD), f32)
    seo = seo.at[:, 0:WpC].set(se).at[:, PAD:PAD + WpC].set(so)

    inputs = (lhs, wbig, b_t, g, bt, p, pt, heo, seo)
    io_bytes = 4 * (sum(a.size for a in inputs) + NHp_pad * PAD)
    flops = (2 * N * Ho * Wo * Cout * KH * KW * Cin                 # useful conv flops
             + 2 * 2 * WC * Cout + 2 * 2 * Cout * WC                # BN stat / tile matmuls
             + 2 * 2 * NHp_pad * (N * Ho) * WC                      # row-pool matmul
             + 2 * NHp_pad * WC * 2 * PAD)                          # col-pool matmul

    vmem = lambda: pl.BlockSpec(memory_space=pltpu.MemorySpace.VMEM)
    out2d = pl.pallas_call(
        _octnet_block_kernel,
        out_shape=jax.ShapeDtypeStruct((NHp_pad, PAD), f32),
        in_specs=[vmem() for _ in inputs],
        out_specs=vmem(),
        # whole working set is ~0.25 MiB; right-sized limit with generous headroom
        compiler_params=pltpu.CompilerParams(vmem_limit_bytes=max(4 << 20, 4 * io_bytes)),
        cost_estimate=pl.CostEstimate(flops=int(flops), transcendentals=int(Cout),
                                      bytes_accessed=int(io_bytes)),
    )(*inputs)
    # TODO(synk): for realistic OCT resolutions grid-tile this: a 'parallel' axis over N /
    # output-row tiles (v7x megacore), an inner 'arbitrary' axis over Wo tiles with banded
    # Toeplitz weight blocks (fits v7x's 64 MiB VMEM), and a two-pass / partial-sum BatchNorm.
    out = out2d[:NHp, :WpC].reshape(N, Hp, Wp, Cout)
    return jnp.transpose(out, (0, 3, 1, 2))                             # NCHW


def _reference(x_nchw, conv_w_oihw, conv_b, gamma, beta):
    x = jnp.transpose(x_nchw, (0, 2, 3, 1))
    w = jnp.transpose(conv_w_oihw, (2, 3, 1, 0))
    y = lax.conv_general_dilated(x, w, (1, 1), 'VALID',
                                 dimension_numbers=('NHWC', 'HWIO', 'NHWC'))
    y = y + conv_b[None, None, None, :]
    y = jnp.maximum(y, 0.0)
    mean = jnp.mean(y, axis=(0, 1, 2), keepdims=True)
    var = jnp.mean((y - mean) ** 2, axis=(0, 1, 2), keepdims=True)
    y = (y - mean) / jnp.sqrt(var + EPS)
    y = y * gamma[None, None, None, :] + beta[None, None, None, :]
    N, Ho, Wo, C = y.shape
    y = y.reshape(N, Ho // 2, 2, Wo // 2, 2, C).max(axis=(2, 4))
    return jnp.transpose(y, (0, 3, 1, 2))


if __name__ == "__main__":
    key = jax.random.PRNGKey(0)
    k1, k2, k3, k4, k5 = jax.random.split(key, 5)
    N, Cin, Cout, H, W, K = 2, 4, 8, 16, 16, 3

    # Deterministic synthetic parameters (shapes match nn.Conv2d / nn.BatchNorm2d).
    x = jax.random.normal(k1, (N, Cin, H, W), jnp.float32)
    conv_w = 0.1 * jax.random.normal(k2, (Cout, Cin, K, K), jnp.float32)
    conv_b = 0.1 * jax.random.normal(k3, (Cout,), jnp.float32)
    gamma = 1.0 + 0.1 * jax.random.normal(k4, (Cout,), jnp.float32)
    beta = 0.1 * jax.random.normal(k5, (Cout,), jnp.float32)
    # TODO(synk): BN running_mean/running_var buffer updates (training-mode side effect)
    # are not modeled; only the tensor returned by forward() is reproduced.

    out = jax.block_until_ready(basic_block_octnet(x, conv_w, conv_b, gamma, beta))
    ref = _reference(x, conv_w, conv_b, gamma, beta)

    assert out.shape == (N, Cout, (H - K + 1) // 2, (W - K + 1) // 2), out.shape
    assert jnp.allclose(out, ref, rtol=1e-4, atol=1e-4), \
        f"max abs err = {jnp.max(jnp.abs(out - ref))}"
    print("KERNEL_OK")
</pallas_src>

<mosaic_0001>
module attributes {stable_mosaic.version = 11 : i64} {
  func.func @_octnet_block_kernel(%arg0: memref<28x192xf32, #tpu.memory_space<vmem>>, %arg1: memref<192x112xf32, #tpu.memory_space<vmem>>, %arg2: memref<1x112xf32, #tpu.memory_space<vmem>>, %arg3: memref<1x8xf32, #tpu.memory_space<vmem>>, %arg4: memref<1x8xf32, #tpu.memory_space<vmem>>, %arg5: memref<112x8xf32, #tpu.memory_space<vmem>>, %arg6: memref<8x112xf32, #tpu.memory_space<vmem>>, %arg7: memref<32x28xf32, #tpu.memory_space<vmem>>, %arg8: memref<112x256xf32, #tpu.memory_space<vmem>>, %arg9: memref<16x128xf32, #tpu.memory_space<vmem>>) attributes {dimension_semantics = [], scalar_prefetch = 0 : i64, scratch_operands = 0 : i64, tpu.core_type = #tpu.core_type<tc>} {
    %c0 = arith.constant 0 : index
    %c0_0 = arith.constant 0 : index
    %0 = vector.load %arg0[%c0, %c0_0] : memref<28x192xf32, #tpu.memory_space<vmem>>, vector<28x192xf32>
    %c0_1 = arith.constant 0 : index
    %c0_2 = arith.constant 0 : index
    %1 = vector.load %arg1[%c0_1, %c0_2] : memref<192x112xf32, #tpu.memory_space<vmem>>, vector<192x112xf32>
    %cst = arith.constant dense<0.000000e+00> : vector<28x112xf32>
    %2 = tpu.matmul %0, %1, %cst {dimension_numbers = #tpu.dot_dimension_numbers<[1], [0], [0], [1], [0, 0, 1, 1], [], []>} : vector<28x192xf32>, vector<192x112xf32>, vector<28x112xf32> -> vector<28x112xf32>
    %c0_3 = arith.constant 0 : index
    %c0_4 = arith.constant 0 : index
    %3 = vector.load %arg2[%c0_3, %c0_4] : memref<1x112xf32, #tpu.memory_space<vmem>>, vector<1x112xf32>
    %4 = vector.broadcast %3 : vector<1x112xf32> to vector<28x112xf32>
    %5 = arith.addf %2, %4 : vector<28x112xf32>
    %cst_5 = arith.constant 0.000000e+00 : f32
    %6 = vector.broadcast %cst_5 : f32 to vector<28x112xf32>
    %7 = arith.maximumf %5, %6 : vector<28x112xf32>
    %cst_6 = arith.constant dense<0.000000e+00> : vector<112xf32>
    %8 = vector.multi_reduction <add>, %7, %cst_6 [0] : vector<28x112xf32> to vector<112xf32>
    %9 = vector.shape_cast %8 : vector<112xf32> to vector<1x112xf32>
    %10 = arith.mulf %7, %7 : vector<28x112xf32>
    %cst_7 = arith.constant dense<0.000000e+00> : vector<112xf32>
    %11 = vector.multi_reduction <add>, %10, %cst_7 [0] : vector<28x112xf32> to vector<112xf32>
    %12 = vector.shape_cast %11 : vector<112xf32> to vector<1x112xf32>
    %13 = tpu.iota {dimensions = array<i32: 0>} : vector<2x112xi32>
    %c0_i32 = arith.constant 0 : i32
    %14 = vector.broadcast %c0_i32 : i32 to vector<2x112xi32>
    %15 = arith.cmpi eq, %13, %14 : vector<2x112xi32>
    %16 = vector.shape_cast %9 : vector<1x112xf32> to vector<1x112xf32>
    %17 = vector.broadcast %16 : vector<1x112xf32> to vector<2x112xf32>
    %18 = vector.shape_cast %12 : vector<1x112xf32> to vector<1x112xf32>
    %19 = vector.broadcast %18 : vector<1x112xf32> to vector<2x112xf32>
    %20 = arith.select %15, %17, %19 : vector<2x112xi1>, vector<2x112xf32>
    %c0_8 = arith.constant 0 : index
    %c0_9 = arith.constant 0 : index
    %21 = vector.load %arg5[%c0_8, %c0_9] : memref<112x8xf32, #tpu.memory_space<vmem>>, vector<112x8xf32>
    %cst_10 = arith.constant dense<0.000000e+00> : vector<2x8xf32>
    %22 = tpu.matmul %20, %21, %cst_10 {dimension_numbers = #tpu.dot_dimension_numbers<[1], [0], [0], [1], [0, 0, 1, 1], [], []>} : vector<2x112xf32>, vector<112x8xf32>, vector<2x8xf32> -> vector<2x8xf32>
    %cst_11 = arith.constant 0.00255102036 : f32
    %23 = vector.broadcast %cst_11 : f32 to vector<2x8xf32>
    %24 = arith.mulf %22, %23 : vector<2x8xf32>
    %25 = vector.extract_strided_slice %24 {offsets = [0, 0], sizes = [1, 8], strides = [1, 1]} : vector<2x8xf32> to vector<1x8xf32>
    %26 = vector.extract_strided_slice %24 {offsets = [1, 0], sizes = [1, 8], strides = [1, 1]} : vector<2x8xf32> to vector<1x8xf32>
    %27 = arith.mulf %25, %25 : vector<1x8xf32>
    %28 = arith.subf %26, %27 : vector<1x8xf32>
    %cst_12 = arith.constant 0.000000e+00 : f32
    %29 = vector.broadcast %cst_12 : f32 to vector<1x8xf32>
    %30 = arith.maximumf %28, %29 : vector<1x8xf32>
    %c0_13 = arith.constant 0 : index
    %c0_14 = arith.constant 0 : index
    %31 = vector.load %arg3[%c0_13, %c0_14] : memref<1x8xf32, #tpu.memory_space<vmem>>, vector<1x8xf32>
    %cst_15 = arith.constant 9.99999974E-6 : f32
    %32 = vector.broadcast %cst_15 : f32 to vector<1x8xf32>
    %33 = arith.addf %30, %32 : vector<1x8xf32>
    %34 = math.rsqrt %33 : vector<1x8xf32>
    %35 = arith.mulf %31, %34 : vector<1x8xf32>
    %c0_16 = arith.constant 0 : index
    %c0_17 = arith.constant 0 : index
    %36 = vector.load %arg4[%c0_16, %c0_17] : memref<1x8xf32, #tpu.memory_space<vmem>>, vector<1x8xf32>
    %37 = arith.mulf %25, %35 : vector<1x8xf32>
    %38 = arith.subf %36, %37 : vector<1x8xf32>
    %39 = tpu.iota {dimensions = array<i32: 0>} : vector<2x8xi32>
    %c0_i32_18 = arith.constant 0 : i32
    %40 = vector.broadcast %c0_i32_18 : i32 to vector<2x8xi32>
    %41 = arith.cmpi eq, %39, %40 : vector<2x8xi32>
    %42 = vector.shape_cast %35 : vector<1x8xf32> to vector<1x8xf32>
    %43 = vector.broadcast %42 : vector<1x8xf32> to vector<2x8xf32>
    %44 = vector.shape_cast %38 : vector<1x8xf32> to vector<1x8xf32>
    %45 = vector.broadcast %44 : vector<1x8xf32> to vector<2x8xf32>
    %46 = arith.select %41, %43, %45 : vector<2x8xi1>, vector<2x8xf32>
    %c0_19 = arith.constant 0 : index
    %c0_20 = arith.constant 0 : index
    %47 = vector.load %arg6[%c0_19, %c0_20] : memref<8x112xf32, #tpu.memory_space<vmem>>, vector<8x112xf32>
    %cst_21 = arith.constant dense<0.000000e+00> : vector<2x112xf32>
    %48 = tpu.matmul %46, %47, %cst_21 {dimension_numbers = #tpu.dot_dimension_numbers<[1], [0], [0], [1], [0, 0, 1, 1], [], []>} : vector<2x8xf32>, vector<8x112xf32>, vector<2x112xf32> -> vector<2x112xf32>
    %49 = vector.extract_strided_slice %48 {offsets = [0, 0], sizes = [1, 112], strides = [1, 1]} : vector<2x112xf32> to vector<1x112xf32>
    %50 = vector.broadcast %49 : vector<1x112xf32> to vector<28x112xf32>
    %51 = arith.mulf %7, %50 : vector<28x112xf32>
    %52 = vector.extract_strided_slice %48 {offsets = [1, 0], sizes = [1, 112], strides = [1, 1]} : vector<2x112xf32> to vector<1x112xf32>
    %53 = vector.broadcast %52 : vector<1x112xf32> to vector<28x112xf32>
    %54 = arith.addf %51, %53 : vector<28x112xf32>
    %c0_22 = arith.constant 0 : index
    %c0_23 = arith.constant 0 : index
    %55 = vector.load %arg7[%c0_22, %c0_23] : memref<32x28xf32, #tpu.memory_space<vmem>>, vector<32x28xf32>
    %cst_24 = arith.constant dense<0.000000e+00> : vector<32x112xf32>
    %56 = tpu.matmul %55, %54, %cst_24 {dimension_numbers = #tpu.dot_dimension_numbers<[1], [0], [0], [1], [0, 0, 1, 1], [], []>} : vector<32x28xf32>, vector<28x112xf32>, vector<32x112xf32> -> vector<32x112xf32>
    %57 = vector.extract_strided_slice %56 {offsets = [0, 0], sizes = [16, 112], strides = [1, 1]} : vector<32x112xf32> to vector<16x112xf32>
    %58 = vector.extract_strided_slice %56 {offsets = [16, 0], sizes = [16, 112], strides = [1, 1]} : vector<32x112xf32> to vector<16x112xf32>
    %59 = arith.maximumf %57, %58 : vector<16x112xf32>
    %c0_25 = arith.constant 0 : index
    %c0_26 = arith.constant 0 : index
    %60 = vector.load %arg8[%c0_25, %c0_26] : memref<112x256xf32, #tpu.memory_space<vmem>>, vector<112x256xf32>
    %cst_27 = arith.constant dense<0.000000e+00> : vector<16x256xf32>
    %61 = tpu.matmul %59, %60, %cst_27 {dimension_numbers = #tpu.dot_dimension_numbers<[1], [0], [0], [1], [0, 0, 1, 1], [], []>} : vector<16x112xf32>, vector<112x256xf32>, vector<16x256xf32> -> vector<16x256xf32>
    %62 = vector.extract_strided_slice %61 {offsets = [0, 0], sizes = [16, 128], strides = [1, 1]} : vector<16x256xf32> to vector<16x128xf32>
    %63 = vector.extract_strided_slice %61 {offsets = [0, 128], sizes = [16, 128], strides = [1, 1]} : vector<16x256xf32> to vector<16x128xf32>
    %64 = arith.maximumf %62, %63 : vector<16x128xf32>
    %c0_28 = arith.constant 0 : index
    %c0_29 = arith.constant 0 : index
    %65 = vector.load %arg9[%c0_28, %c0_29] : memref<16x128xf32, #tpu.memory_space<vmem>>, vector<16x128xf32>
    tpu.vector_store %arg9[%c0_28, %c0_29], %64 {strides = array<i32>} : memref<16x128xf32, #tpu.memory_space<vmem>>, vector<16x128xf32>,
    return
  }
}

</mosaic_0001>

<bundles_post_ra>
// kernel: tpu_custom_call.1
= control target key start
LH: loop header
LB: loop body
LE: loop exit
PB: predicated region body
PF: predicated region fallthrough
CT: control target
= control target key end

     0   :  { %14 = vsyncpa [#allocation3], 0  ;;  %s779_s0 = inlined_call_operand.vmem [shape: f32[28,192], index: 0, kind: input, shape index: {}]   ;;  %s780_s1 = inlined_call_operand.hbm [shape: f32[192,112], index: 1, kind: input, shape index: {}]   ;;  %s781_s2 = inlined_call_operand.vmem [shape: f32[1,112], index: 2, kind: input, shape index: {}]   ;;  %s782_s3 = inlined_call_operand.vmem [shape: f32[1,8], index: 3, kind: input, shape index: {}]   ;;  %s783_s4 = inlined_call_operand.vmem [shape: f32[1,8], index: 4, kind: input, shape index: {}]   ;;  %s784_s5 = inlined_call_operand.vmem [shape: f32[112,8], index: 5, kind: input, shape index: {}]   ;;  %s785_s6 = inlined_call_operand.vmem [shape: f32[8,112], index: 6, kind: input, shape index: {}]   ;;  %s786_s7 = inlined_call_operand.vmem [shape: f32[32,28], index: 7, kind: input, shape index: {}]   ;;  %s787_s8 = inlined_call_operand.hbm [shape: f32[112,256], index: 8, kind: input, shape index: {}]   ;;  %s788_s9 = inlined_call_operand.hbm [shape: f32[16,128], index: 9, kind: output, shape index: {}]  }
   0x1   :  { %15 = vsyncpa [#allocation6], 0 }
   0x2   :  { %16 = vsyncpa [#allocation4], 0  ;;  %s23_s11 = sshll.u32 %s780_s1, 4  ;;  %s578_s12 = smov [#allocation2]   ;;  %s24_s11 = int_to_ptr.hbm [resolvable:$true] %s23_s11 }
   0x3   :  { %s25_s13 = sshll.u32 %s578_s12, 4  ;;  %s48_s16 = sshll.u32 %s787_s8, 4  ;;  %s26_s13 = int_to_ptr.vmem [resolvable:$true] %s25_s13  ;;  %s49_s16 = int_to_ptr.hbm [resolvable:$true] %s48_s16 }
   0x4   :  { %s579_s17 = smov 128   ;;  %s580_s18 = smov 8  }
   0x5   :  { %31 = dma.hbm_to_vmem [thread:$0]  %s24_s11, 3072, %s26_s13, [#allocation3], %s579_s17, %s579_s17, %s580_s18  }
   0x6   :  { %s581_s19 = smov [#allocation5]   ;;  %s582_s21 = smov 256  }
   0x7   :  { %s50_s20 = sshll.u32 %s581_s19, 4  ;;  %s583_s1 = smov 16   ;;  %s51_s20 = int_to_ptr.vmem [resolvable:$true] %s50_s20 }
   0x8   :  { %56 = dma.hbm_to_vmem [thread:$0]  %s49_s16, 3584, %s51_s20, [#allocation6], %s582_s21, %s582_s21, %s583_s1  }
   0x9   :  { %572 = dma.done.wait [#allocation3], 3072  }
   0xa   :  { %573 = vsyncadd [#allocation3], 4294964224 }
   0xb   :  { %574 = dma.done.wait [#allocation6], 3584  }
   0xc   :  { %575 = vsyncadd [#allocation6], 4294963712  ;;  %v88_v0 = vld [vmem:[#allocation2 + $0x78] sm:$0xff]  ;;  %v87_v1 = vld [vmem:[#allocation2 + $0x70] sm:$0xff]  ;;  %vm101_vm0 = vcmask 523264   ;;  %vm176_vm1 = vcmask 916480  }
   0xd   :  { %114 = vmatpush.msra.mxu0 %v88_v0  ;;  %v86_v2 = vld [vmem:[#allocation2 + $0x68] sm:$0xff]  ;;  %v96_v3 = vld [vmem:[#allocation2 + $0xb8] sm:$0xff]  ;;  %v85_v4 = vld [vmem:[#allocation2 + $0x60] sm:$0xff]  ;;  %vm182_vm2 = vcmask 912384   ;;  %vm285_vm7 = vcmask 64512   ;;  %vm336_vm8 = vcmask 1043456  }
   0xe   :  { %151 = vmatpush.msra.mxu1 %v96_v3  ;;  %v95_v5 = vld [vmem:[#allocation2 + $0xb0] sm:$0xff]  ;;  %v94_v6 = vld [vmem:[#allocation2 + $0xa8] sm:$0xff]  ;;  %v84_v7 = vld [vmem:[#allocation2 + $0x58] sm:$0xff]  ;;  %vm323_vm9 = vcmask 228352   ;;  %s461_s14 = sshll.u32 %s788_s9, 4  ;;  %s462_s14 = int_to_ptr.hbm [resolvable:$true] %s461_s14 }
   0xf   :  { %115 = vmatpush.msra.mxu0 %v87_v1  ;;  %v93_v8 = vld [vmem:[#allocation2 + $0xa0] sm:$0xff]  ;;  %v83_v9 = vld [vmem:[#allocation2 + $0x50] sm:$0xff]  ;;  %v92_v10 = vld [vmem:[#allocation2 + $0x98] sm:$0xff] }
  0x10   :  { %152 = vmatpush.msra.mxu1 %v95_v5  ;;  %v82_v11 = vld [vmem:[#allocation2 + $0x48] sm:$0xff]  ;;  %v91_v12 = vld [vmem:[#allocation2 + $0x90] sm:$0xff]  ;;  %v81_v13 = vld [vmem:[#allocation2 + $0x40] sm:$0xff] }
  0x11   :  { %116 = vmatpush.msra.mxu0 %v86_v2  ;;  %v90_v14 = vld [vmem:[#allocation2 + $0x88] sm:$0xff]  ;;  %v80_v15 = vld [vmem:[#allocation2 + $0x38] sm:$0xff]  ;;  %v89_v16 = vld [vmem:[#allocation2 + $0x80] sm:$0xff] }
  0x12   :  { %153 = vmatpush.msra.mxu1 %v94_v6  ;;  %v79_v17 = vld [vmem:[#allocation2 + $0x30] sm:$0xff]  ;;  %v66_v18 = vld [vmem:[%s779_s0 + $0x8] sm:$0xff]  ;;  %v78_v19 = vld [vmem:[#allocation2 + $0x28] sm:$0xff] }
  0x13   :  { %117 = vmatpush.msra.mxu0 %v85_v4  ;;  %v77_v20 = vld [vmem:[#allocation2 + $0x20] sm:$0xff]  ;;  %v76_v21 = vld [vmem:[#allocation2 + $0x18] sm:$0xff]  ;;  %v75_v22 = vld [vmem:[#allocation2 + $0x10] sm:$0xff] }
  0x14   :  { %154 = vmatpush.msra.mxu1 %v93_v8  ;;  %v68_v23 = vld [vmem:[%s779_s0 + $0x18] sm:$0xff]  ;;  %v74_v24 = vld [vmem:[#allocation2 + $0x8] sm:$0xff]  ;;  %v73_v25 = vld [vmem:[#allocation2] sm:$0xff] }
  0x15   :  { %118 = vmatpush.msra.mxu0 %v84_v7  ;;  %v65_v26 = vld [vmem:[%s779_s0] sm:$0xff]  ;;  %v70_v27 = vld [vmem:[%s779_s0 + $0x28] sm:$0xff]  ;;  %v67_v28 = vld [vmem:[%s779_s0 + $0x10] sm:$0xff] }
  0x16   :  { %155 = vmatpush.msra.mxu1 %v92_v10  ;;  %v72_v29 = vld [vmem:[%s779_s0 + $0x38] sm:$0xf]  ;;  %v69_v30 = vld [vmem:[%s779_s0 + $0x20] sm:$0xff]  ;;  %v71_v31 = vld [vmem:[%s779_s0 + $0x30] sm:$0xf] }
  0x17   :  { %119 = vmatpush.msra.mxu0 %v83_v9  ;;  %v225_v32 = vld [vmem:[%s784_s5 + $0x68] sm:$0xff]  ;;  %v224_v33 = vld [vmem:[%s784_s5 + $0x60] sm:$0xff]  ;;  %v223_v34 = vld [vmem:[%s784_s5 + $0x58] sm:$0xff] }
  0x18   :  { %156 = vmatpush.msra.mxu1 %v91_v12  ;;  %231 = vmatpush.msra.mxu2 %v225_v32  ;;  %v222_v36 = vld [vmem:[%s784_s5 + $0x50] sm:$0xff]  ;;  %v221_v37 = vld [vmem:[%s784_s5 + $0x48] sm:$0xff]  ;;  %v220_v38 = vld [vmem:[%s784_s5 + $0x40] sm:$0xff] }
  0x19   :  { %120 = vmatpush.msra.mxu0 %v82_v11  ;;  %v219_v40 = vld [vmem:[%s784_s5 + $0x38] sm:$0xff]  ;;  %v218_v41 = vld [vmem:[%s784_s5 + $0x30] sm:$0xff]  ;;  %v217_v43 = vld [vmem:[%s784_s5 + $0x28] sm:$0xff] }
  0x1a   :  { %157 = vmatpush.msra.mxu1 %v90_v14  ;;  %232 = vmatpush.msra.mxu2 %v224_v33  ;;  %v216_v44 = vld [vmem:[%s784_s5 + $0x20] sm:$0xff]  ;;  %v215_v45 = vld [vmem:[%s784_s5 + $0x18] sm:$0xff]  ;;  %v214_v48 = vld [vmem:[%s784_s5 + $0x10] sm:$0xff] }
  0x1b   :  { %121 = vmatpush.msra.mxu0 %v81_v13  ;;  %v497_v47 = vld [vmem:[%s781_s2] ss:$0 sm:$0xff]  ;;  %v213_v50 = vld [vmem:[%s784_s5 + $0x8] sm:$0xff] }
  0x1c   :  { %158 = vmatpush.msra.mxu1 %v89_v16  ;;  %233 = vmatpush.msra.mxu2 %v223_v34  ;;  %v212_v52 = vld [vmem:[%s784_s5] sm:$0xff] }
  0x1d   :  { %122 = vmatpush.msra.mxu0 %v80_v15  ;;  %475 = vmatmul.msk.f32.vlgmr.msra.gmra.mxu1 %vm101_vm0, %v66_v18 }
  0x1e   :  { %234 = vmatpush.msra.mxu2 %v222_v36 }
  0x1f   :  { %123 = vmatpush.msra.mxu0 %v79_v17 }
  0x20   :  { %235 = vmatpush.msra.mxu2 %v221_v37 }
  0x21   :  { %124 = vmatpush.msra.mxu0 %v78_v19 }
  0x22   :  { %236 = vmatpush.msra.mxu2 %v220_v38 }
  0x23   :  { %125 = vmatpush.msra.mxu0 %v77_v20 }
  0x24   :  { %237 = vmatpush.msra.mxu2 %v219_v40 }
  0x25   :  { %126 = vmatpush.msra.mxu0 %v76_v21  ;;  %476 = vmatmul.msk.f32.gmra.mxu1 %vm101_vm0, %v68_v23 }
  0x26   :  { %238 = vmatpush.msra.mxu2 %v218_v41 }
  0x27   :  { %127 = vmatpush.msra.mxu0 %v75_v22 }
  0x28   :  { %239 = vmatpush.msra.mxu2 %v217_v43  ;;  %v284_v43 = vld [vmem:[%s785_s6] sm:$0xff] }
  0x29   :  { %128 = vmatpush.msra.mxu0 %v74_v24  ;;  %v208_v24 = vlaneseq  ;;  %304 = vmatpush.msra.mxu3 %v284_v43 }
  0x2a   :  { %240 = vmatpush.msra.mxu2 %v216_v44 }
  0x2b   :  { %129 = vmatpush.msra.mxu0 %v73_v25 }
  0x2c   :  { %130 = vmatmul.f32.vlgmr.msra.gmra.mxu0 %v65_v26  ;;  %241 = vmatpush.msra.mxu2 %v215_v45 }
  0x2d   :  { %477 = vmatmul.msk.f32.gmra.mxu1 %vm101_vm0, %v70_v27 }
  0x2e   :  { %242 = vmatpush.msra.mxu2 %v214_v48 }
  0x30   :  { %243 = vmatpush.msra.mxu2 %v213_v50 }
  0x32   :  { %244 = vmatpush.msra.mxu2 %v212_v52 }
  0x34   :  { %133 = vmatmul.f32.gmra.mxu0 %v67_v28 }
  0x35   :  { %478 = vmatmul.msk.f32.gmra.mxu1 %vm101_vm0, %v72_v29  ;;  %v209_v29 = vshrl.u32 %v208_v24, 7  ;;  %v386_v24 = vld [vmem:[#allocation5 + $0x78] sm:$0xff] }
  0x37   :  { %vm210_vm3 = vcmp.eq.s32.totalorder %v209_v29, 0  ;;  %v379_v29 = vld [vmem:[#allocation5 + $0x40] sm:$0xff] }
  0x3c   :  { %136 = vmatmul.f32.gmra.mxu0 %v69_v30 }
  0x44   :  { %139 = vmatmul.f32.gmra.mxu0 %v71_v31 }
  0x9a   :  { %v160_v35 = vpop.f32.mrf.mxu1 }
  0xa2   :  { %v163_v42 = vpop.f32.mrf.mxu1 }
  0xa9   :  { %v131_v39 = vpop.f32.mrf.mxu0 }
  0xaa   :  { %v132_v51 = vadd.f32 %v497_v47, %v131_v39  ;;  %v166_v53 = vpop.f32.mrf.mxu1 }
  0xac   :  { %v161_v56 = vadd.f32 %v160_v35, %v132_v51  ;;  %v256_v51 = vld [vmem:[%s782_s3] sm:$0x1] }
  0xae   :  { %v719_v60 = vmax.f32 %v161_v56, 0.0 }
  0xb0   :  { %v191_v1 = vmul.f32 %v719_v60, %v719_v60  ;;  %v177_v5 = vsel %vm176_vm1, %v719_v60, 0.0 }
  0xb1   :  { %v134_v46 = vpop.f32.mrf.mxu0 }
  0xb2   :  { %v135_v49 = vadd.f32 %v497_v47, %v134_v46  ;;  %v169_v0 = vpop.f32.mrf.mxu1  ;;  %v195_v10 = vsel %vm176_vm1, %v191_v1, 0.0 }
  0xb4   :  { %v164_v54 = vadd.f32 %v163_v42, %v135_v49 }
  0xb6   :  { %v717_v58 = vmax.f32 %v164_v54, 0.0  ;;  %v274_v54 = vld [vmem:[%s783_s4] sm:$0x1] }
  0xb8   :  { %v192_v62 = vmul.f32 %v717_v58, %v717_v58  ;;  %v178_v2 = vsel %vm176_vm1, %v717_v58, 0.0 }
  0xb9   :  { %v137_v55 = vpop.f32.mrf.mxu0  ;;  %v179_v9 = vadd.f32 %v178_v2, %v177_v5 }
  0xba   :  { %v138_v57 = vadd.f32 %v497_v47, %v137_v55  ;;  %v196_v6 = vsel %vm176_vm1, %v192_v62, 0.0 }
  0xbb   :  { %v197_v13 = vadd.f32 %v196_v6, %v195_v10  ;;  %v398_v6 = vld [vmem:[#allocation5 + $0xd8] sm:$0xff] }
  0xbc   :  { %v167_v59 = vadd.f32 %v166_v53, %v138_v57  ;;  %430 = vmatpush.msrb.mxu1 %v398_v6  ;;  %v394_v10 = vld [vmem:[#allocation5 + $0xb8] sm:$0xff] }
  0xbe   :  { %v721_v61 = vmax.f32 %v167_v59, 0.0 }
  0xc0   :  { %v193_v3 = vmul.f32 %v721_v61, %v721_v61  ;;  %v180_v7 = vsel %vm176_vm1, %v721_v61, 0.0 }
  0xc1   :  { %v140_v63 = vpop.f32.mrf.mxu0  ;;  %v181_v14 = vadd.f32 %v180_v7, %v179_v9  ;;  %v396_v9 = vld [vmem:[#allocation5 + $0xc8] sm:$0xff] }
  0xc2   :  { %v141_v4 = vadd.f32 %v497_v47, %v140_v63  ;;  %v198_v11 = vsel %vm176_vm1, %v193_v3, 0.0  ;;  %431 = vmatpush.msrb.mxu1 %v396_v9 }
  0xc3   :  { %v199_v17 = vadd.f32 %v198_v11, %v197_v13  ;;  %v392_v13 = vld [vmem:[#allocation5 + $0xa8] sm:$0xff] }
  0xc4   :  { %v170_v8 = vadd.f32 %v169_v0, %v141_v4  ;;  %432 = vmatpush.msrb.mxu1 %v394_v10 }
  0xc6   :  { %v175_v12 = vmax.f32 %v170_v8, 0.0  ;;  %433 = vmatpush.msrb.mxu1 %v392_v13 }
  0xc8   :  { %v183_v15 = vsel %vm182_vm2, %v175_v12, 0.0  ;;  %v194_v16 = vmul.f32 %v175_v12, %v175_v12 }
  0xc9   :  { %v184_v18 = vadd.f32 %v183_v15, %v181_v14  ;;  %v393_v14 = vld [vmem:[#allocation5 + $0xb0] sm:$0xff]  ;;  %v391_v15 = vld [vmem:[#allocation5 + $0xa0] sm:$0xff] }
  0xca   :  { %v200_v19 = vsel %vm182_vm2, %v194_v16, 0.0  ;;  %v320_v16 = vld [vmem:[%s786_s7 + $0x8] sm:$0xff] }
  0xcb   :  { %v185_v20 = vrot.slane %v184_v18, 4  ;;  %v201_v21 = vadd.f32 %v200_v19, %v199_v17  ;;  %v389_v17 = vld [vmem:[#allocation5 + $0x90] sm:$0xff] }
  0xcc   :  { %v322_v19 = vld [vmem:[%s786_s7 + $0x18] sm:$0xff] }
  0xcd   :  { %v186_v22 = vadd.f32 %v185_v20, %v184_v18  ;;  %v202_v23 = vrot.slane %v201_v21, 4  ;;  %v321_v18 = vld [vmem:[%s786_s7 + $0x10] sm:$0xff]  ;;  %v390_v20 = vld [vmem:[#allocation5 + $0x98] sm:$0xff] }
  0xce   :  { %434 = vmatpush.msrb.mxu1 %v390_v20 }
  0xcf   :  { %v187_v25 = vrot.slane %v186_v22, 2  ;;  %v203_v26 = vadd.f32 %v202_v23, %v201_v21  ;;  %v387_v21 = vld [vmem:[#allocation5 + $0x80] sm:$0xff]  ;;  %v388_v23 = vld [vmem:[#allocation5 + $0x88] sm:$0xff] }
  0xd0   :  { %435 = vmatpush.msrb.mxu1 %v388_v23 }
  0xd1   :  { %v188_v27 = vadd.f32 %v187_v25, %v186_v22  ;;  %v204_v28 = vrot.slane %v203_v26, 2  ;;  %v385_v22 = vld [vmem:[#allocation5 + $0x70] sm:$0xff]  ;;  %v383_v25 = vld [vmem:[#allocation5 + $0x60] sm:$0xff] }
  0xd2   :  { %436 = vmatpush.msrb.mxu1 %v386_v24 }
  0xd3   :  { %v189_v30 = vrot.slane %v188_v27, 1  ;;  %v205_v31 = vadd.f32 %v204_v28, %v203_v26  ;;  %v384_v26 = vld [vmem:[#allocation5 + $0x68] sm:$0xff]  ;;  %v382_v28 = vld [vmem:[#allocation5 + $0x58] sm:$0xff] }
  0xd4   :  { %437 = vmatpush.msrb.mxu1 %v384_v26 }
  0xd5   :  { %v206_v32 = vrot.slane %v205_v31, 1  ;;  %v190_v33 = vadd.f32 %v189_v30, %v188_v27  ;;  %v381_v27 = vld [vmem:[#allocation5 + $0x50] sm:$0xff]  ;;  %v380_v30 = vld [vmem:[#allocation5 + $0x48] sm:$0xff] }
  0xd6   :  { %438 = vmatpush.msrb.mxu1 %v382_v28 }
  0xd7   :  { %v207_v34 = vadd.f32 %v206_v32, %v205_v31  ;;  %v377_v31 = vld [vmem:[#allocation5 + $0x30] sm:$0xff]  ;;  %v378_v32 = vld [vmem:[#allocation5 + $0x38] sm:$0xff] }
  0xd8   :  { %439 = vmatpush.msrb.mxu1 %v380_v30 }
  0xd9   :  { %v211_v35 = vsel %vm210_vm3, %v190_v33, %v207_v34  ;;  %v375_v33 = vld [vmem:[#allocation5 + $0x20] sm:$0xff]  ;;  %v376_v34 = vld [vmem:[#allocation5 + $0x28] sm:$0xff] }
  0xda   :  { %479 = vmatmul.msk.f32.vlgmr.msra.gmra.mxu2 %vm176_vm1, %v211_v35  ;;  %440 = vmatpush.msrb.mxu1 %v378_v32  ;;  %v373_v35 = vld [vmem:[#allocation5 + $0x10] sm:$0xff] }
  0xdc   :  { %441 = vmatpush.msrb.mxu1 %v376_v34 }
 0x15d   :  { %v246_v36 = vpop.f32.mrf.mxu2 }
 0x15e   :  { %v249_v37 = vmul.f32 0.0025510204, %v246_v36  ;;  %v374_v36 = vld [vmem:[#allocation5 + $0x18] sm:$0xff] }
 0x15f   :  { %442 = vmatpush.msrb.mxu1 %v374_v36 }
 0x160   :  { %v250_v38 = vmul.f32 %v249_v37, %v249_v37 }
 0x162   :  { %v252_v39 = vrot.slane %v250_v38, 7  ;;  %v372_v38 = vld [vmem:[#allocation5 + $0x8] sm:$0xff] }
 0x163   :  { %443 = vmatpush.msrb.mxu1 %v372_v38 }
 0x164   :  { %v254_v40 = vsub.f32 %v249_v37, %v252_v39 }
 0x166   :  { %v255_v41 = vmax.f32 %v254_v40, 0.0 }
 0x168   :  { %v257_v42 = vadd.f32 1e-05, %v255_v41 }
 0x16a   :  { %498 = vrsqrt.f32 %v257_v42  ;;  %vm264_vm5 = vweird.f32 %v257_v42 }
 0x170   :  { %v499_v44 = vpop.eup %498 }
 0x171   :  { %v259_v45 = vmul.f32 %v499_v44, %v257_v42  ;;  %vm265_vm4 = vweird.f32 %v499_v44 }
 0x172   :  { %vm266_vm6 = vmor %vm264_vm5, %vm265_vm4 }
 0x173   :  { %v260_v46 = vmul.f32 %v499_v44, %v259_v45 }
 0x175   :  { %v261_v47 = vmul.f32 0.5, %v260_v46 }
 0x177   :  { %v262_v48 = vsub.f32 1.5, %v261_v47 }
 0x179   :  { %v263_v49 = vmul.f32 %v499_v44, %v262_v48 }
 0x17b   :  { %v267_v50 = vsel %vm266_vm6, %v499_v44, %v263_v49 }
 0x17c   :  { %269 = vst [vmem:[#allocation1] sm:$0xff] %v267_v50 }
 0x183   :  { %v271_v52 = vld [vmem:[#allocation1 + $0x1] ss:$9 sm:$0xff] }
 0x184   :  { %v273_v53 = vmul.f32 %v271_v52, %v256_v51 }
 0x186   :  { %v275_v55 = vmul.f32 %v273_v53, %v249_v37  ;;  %v278_v57 = vperm.slane %v273_v53, 0  ;;  %v371_v37 = vld [vmem:[#allocation5] sm:$0xff] }
 0x188   :  { %v276_v56 = vsub.f32 %v274_v54, %v275_v55 }
 0x18a   :  { %v281_v59 = vperm.slane %v276_v56, 0 }
 0x18c   :  { %v283_v62 = vsel %vm210_vm3, %v278_v57, %v281_v59 }
 0x18d   :  { %480 = vmatmul.msk.f32.vlgmr.msra.gmra.mxu3 %vm285_vm7, %v283_v62 }
 0x210   :  { %v306_v63 = vpop.f32.mrf.mxu3 }
 0x211   :  { %v309_v0 = vperm.slane %v306_v63, 0  ;;  %v314_v1 = vperm.slane %v306_v63, 1 }
 0x213   :  { %v313_v2 = vmul.f32 %v309_v0, %v175_v12  ;;  %v312_v3 = vmul.f32 %v309_v0, %v721_v61  ;;  %v311_v5 = vmul.f32 %v309_v0, %v717_v58  ;;  %v310_v8 = vmul.f32 %v309_v0, %v719_v60  ;;  %v319_v61 = vld [vmem:[%s786_s7] sm:$0xff]  ;;  %v397_v58 = vld [vmem:[#allocation5 + $0xd0] sm:$0xff]  ;;  %v395_v60 = vld [vmem:[#allocation5 + $0xc0] sm:$0xff]  ;;  %s584_s7 = smov [#allocation7]  }
 0x214   :  { %s459_s11 = sshll.u32 %s584_s7, 4  ;;  %s460_s11 = int_to_ptr.vmem [resolvable:$true] %s459_s11 }
 0x215   :  { %v318_v4 = vadd.f32 %v314_v1, %v313_v2  ;;  %v317_v7 = vadd.f32 %v314_v1, %v312_v3  ;;  %v316_v11 = vadd.f32 %v314_v1, %v311_v5  ;;  %v315_v12 = vadd.f32 %v314_v1, %v310_v8 }
 0x217   :  { %481 = vmatpush.msk.msrb.mxu3 %vm336_vm8, %v318_v4 }
 0x219   :  { %353 = vmatpush.msrb.mxu3 %v317_v7 }
 0x21b   :  { %354 = vmatpush.msrb.mxu3 %v316_v11 }
 0x21d   :  { %355 = vmatpush.msrb.mxu3 %v315_v12 }
 0x21e   :  { %482 = vmatmul.msk.f32.vlgmr.msrb.gmra.mxu3 %vm323_vm9, %v319_v61 }
 0x21f   :  { %407 = vmatpush.msra.mxu3 %v397_v58 }
 0x221   :  { %408 = vmatpush.msra.mxu3 %v395_v60 }
 0x223   :  { %409 = vmatpush.msra.mxu3 %v393_v14 }
 0x225   :  { %410 = vmatpush.msra.mxu3 %v391_v15 }
 0x226   :  { %483 = vmatmul.msk.f32.gmra.mxu3 %vm323_vm9, %v320_v16 }
 0x227   :  { %411 = vmatpush.msra.mxu3 %v389_v17 }
 0x229   :  { %412 = vmatpush.msra.mxu3 %v387_v21 }
 0x22b   :  { %413 = vmatpush.msra.mxu3 %v385_v22 }
 0x22d   :  { %414 = vmatpush.msra.mxu3 %v383_v25 }
 0x22e   :  { %484 = vmatmul.msk.f32.gmra.mxu3 %vm323_vm9, %v321_v18 }
 0x22f   :  { %415 = vmatpush.msra.mxu3 %v381_v27 }
 0x231   :  { %416 = vmatpush.msra.mxu3 %v379_v29 }
 0x233   :  { %417 = vmatpush.msra.mxu3 %v377_v31 }
 0x235   :  { %418 = vmatpush.msra.mxu3 %v375_v33 }
 0x236   :  { %485 = vmatmul.msk.f32.gmra.mxu3 %vm323_vm9, %v322_v19 }
 0x237   :  { %419 = vmatpush.msra.mxu3 %v373_v35 }
 0x239   :  { %420 = vmatpush.msra.mxu3 %v371_v37 }
 0x2a1   :  { %v357_v39 = vpop.f32.mrf.mxu3 }
 0x2a9   :  { %v360_v40 = vpop.f32.mrf.mxu3 }
 0x2b1   :  { %v363_v41 = vpop.f32.mrf.mxu3 }
 0x2b2   :  { %v369_v42 = vmax.f32 %v357_v39, %v363_v41 }
 0x2b4   :  { %486 = vmatmul.msk.f32.vlgmr.msra.gmra.mxu3 %vm176_vm1, %v369_v42  ;;  %488 = vmatmul.msk.f32.vlgmr.msrb.gmra.mxu1 %vm176_vm1, %v369_v42 }
 0x2b9   :  { %v366_v43 = vpop.f32.mrf.mxu3 }
 0x2ba   :  { %v370_v44 = vmax.f32 %v360_v40, %v366_v43 }
 0x2bc   :  { %487 = vmatmul.msk.f32.gmra.mxu3 %vm176_vm1, %v370_v44  ;;  %489 = vmatmul.msk.f32.gmra.mxu1 %vm176_vm1, %v370_v44 }
 0x331   :  { %v445_v45 = vpop.f32.mrf.mxu1 }
 0x337   :  { %v422_v46 = vpop.f32.mrf.mxu3 }
 0x338   :  { %v451_v47 = vmax.f32 %v422_v46, %v445_v45 }
 0x339   :  { %v448_v48 = vpop.f32.mrf.mxu1 }
 0x33a   :  { %453 = vst [vmem:[#allocation7] sm:$0xff] %v451_v47 }
 0x33f   :  { %v425_v49 = vpop.f32.mrf.mxu3 }
 0x340   :  { %v452_v50 = vmax.f32 %v425_v49, %v448_v48 }
 0x342   :  { %454 = vst [vmem:[#allocation7 + $0x8] sm:$0xff] %v452_v50 }
 0x343   :  { %467 = dma.vmem_to_hbm [thread:$0]  %s460_s11, 256, %s462_s14, [#allocation4], %s579_s17, %s579_s17, %s580_s18  }
 0x344   :  { %576 = dma.done.wait [#allocation4], 256  }
 0x345   :  { %577 = vsyncadd [#allocation4], 4294967040 }
 0x346   :  { %472 = vsyncpa [#allocation3], 1 }
 0x347   :  { %473 = vsyncpa [#allocation6], 1 }
 0x348   :  { %474 = vsyncpa [#allocation4], 1 }

</bundles_post_ra>
